<compile_context>
chip_gen: v7x
topology: tpu7x:2x2x1
jax: 0.10.0
libtpu: 0.0.40
codegen_flags: <defaults>
</compile_context>

<pallas_src>
import numpy as np
import jax
import jax.numpy as jnp
from jax.experimental import pallas as pl
from jax.experimental.pallas import tpu as pltpu

LANE = 128


def _round_up(x, m):
    return ((x + m - 1) // m) * m


# ----------------------------------------------------------------------------
# Pallas kernel 1: fused Linear + (folded, eval-mode) BatchNorm + ReLU
#   y = relu(x @ W_folded + b_folded)        W_folded: [Cin, Cout_pad]
# ----------------------------------------------------------------------------
def _proj_kernel(x_ref, w_ref, b_ref, o_ref):
    y = jnp.dot(x_ref[...], w_ref[...], preferred_element_type=jnp.float32)
    o_ref[...] = jnp.maximum(y + b_ref[...], 0.0)


def fused_linear_bn_relu(x, w_folded, b_folded, *, block_rows=256):
    """x: [N, Cin] f32, w_folded: [Cin, Cout_pad], b_folded: [1, Cout_pad]."""
    N, Cin = x.shape
    Cout_pad = w_folded.shape[1]
    bm = N if N <= block_rows else block_rows          # full dim or mult-of-8 block
    grid = (pl.cdiv(N, bm),)
    return pl.pallas_call(
        _proj_kernel,
        out_shape=jax.ShapeDtypeStruct((N, Cout_pad), jnp.float32),
        grid_spec=pltpu.PrefetchScalarGridSpec(
            num_scalar_prefetch=0,
            grid=grid,
            in_specs=[
                pl.BlockSpec((bm, Cin), lambda i: (i, 0)),
                pl.BlockSpec((Cin, Cout_pad), lambda i: (0, 0)),
                pl.BlockSpec((1, Cout_pad), lambda i: (0, 0)),
            ],
            out_specs=pl.BlockSpec((bm, Cout_pad), lambda i: (i, 0)),
        ),
        compiler_params=pltpu.CompilerParams(dimension_semantics=("parallel",)),
    )(x, w_folded, b_folded)


# ----------------------------------------------------------------------------
# Pallas kernel 2: segment max over padded per-parent child features
#   in : x_gat [P, Kmax, Cpad]  (child rows gathered per parent, padding = repeat)
#        mask  [P, 1]           (1.0 if parent has >=1 child else 0.0)
#   out: [P, Cpad]   = max over children  (zeroed for empty parents)
# ----------------------------------------------------------------------------
def _segmax_kernel(x_ref, mask_ref, o_ref):
    o_ref[...] = jnp.max(x_ref[...], axis=1) * mask_ref[...]


def segment_max(x_gat, mask, *, block_rows=128):
    P, Kmax, Cpad = x_gat.shape
    bp = P if P <= block_rows else block_rows
    grid = (pl.cdiv(P, bp),)
    return pl.pallas_call(
        _segmax_kernel,
        out_shape=jax.ShapeDtypeStruct((P, Cpad), jnp.float32),
        grid_spec=pltpu.PrefetchScalarGridSpec(
            num_scalar_prefetch=0,
            grid=grid,
            in_specs=[
                pl.BlockSpec((bp, Kmax, Cpad), lambda i: (i, 0, 0)),
                pl.BlockSpec((bp, 1), lambda i: (i, 0)),
            ],
            out_specs=pl.BlockSpec((bp, Cpad), lambda i: (i, 0)),
        ),
        compiler_params=pltpu.CompilerParams(dimension_semantics=("parallel",)),
    )(x_gat, mask)


# ----------------------------------------------------------------------------
# Parameter construction + one-time folding (BN fold, transpose, lane padding)
# ----------------------------------------------------------------------------
def make_projection_params(key, in_dim, out_dim):
    kw, kb, kg, kbe = jax.random.split(key, 4)
    return dict(
        w=jax.random.normal(kw, (out_dim, in_dim), jnp.float32) / np.sqrt(in_dim),
        b=0.1 * jax.random.normal(kb, (out_dim,), jnp.float32),
        bn_gamma=1.0 + 0.1 * jax.random.normal(kg, (out_dim,), jnp.float32),
        bn_beta=0.1 * jax.random.normal(kbe, (out_dim,), jnp.float32),
        bn_mean=jnp.zeros((out_dim,), jnp.float32),
        bn_var=jnp.ones((out_dim,), jnp.float32),
    )


def fold_projection(prm, in_rows_pad=None, eps=1e-5):
    """Fold eval-mode BN into the linear, transpose to [in,out], pad lanes."""
    w = prm["w"]                                   # [out, in] (torch layout)
    out_dim, in_dim = w.shape
    s = prm["bn_gamma"] * jax.lax.rsqrt(prm["bn_var"] + eps)
    w_f = (w * s[:, None]).T                       # [in, out]
    b_f = (prm["b"] - prm["bn_mean"]) * s + prm["bn_beta"]
    out_pad = _round_up(out_dim, LANE)
    in_rows = in_dim if in_rows_pad is None else in_rows_pad
    w_pad = jnp.zeros((in_rows, out_pad), jnp.float32).at[:in_dim, :out_dim].set(w_f)
    b_pad = jnp.zeros((1, out_pad), jnp.float32).at[0, :out_dim].set(b_f)
    return w_pad, b_pad, out_dim


def prepare_init_params(key, in_channel, dim, depth, expand):
    keys = jax.random.split(key, depth)
    raw, folded = [], []
    prev_pad = None
    for i in range(depth):
        cin = in_channel if i == 0 else dim * expand ** (i - 1)
        cout = dim * expand ** i
        raw.append(make_projection_params(keys[i], cin, cout))
        w_pad, b_pad, cout_real = fold_projection(raw[i], in_rows_pad=prev_pad)
        folded.append((w_pad, b_pad, cout_real))
        prev_pad = w_pad.shape[1]                   # next level consumes padded slab
    return raw, folded


# ----------------------------------------------------------------------------
# Init.forward
# ----------------------------------------------------------------------------
def init_forward(folded, depth, pxbim):
    p, x, b, idx, m = pxbim
    m_np = np.asarray(m)
    p_j = jnp.asarray(p, jnp.float32)
    b_j = jnp.asarray(b)

    p_c, x_c, b_c = [], [], []
    x_proj_pad = jnp.asarray(x, jnp.float32)        # level-0 raw features

    for i, ii in enumerate(idx):
        ii_j = jnp.asarray(np.asarray(ii), jnp.int32)

        # gather + fused Linear/BN/ReLU projection (lane-dense padded output)
        x_in = x_proj_pad[ii_j]
        w_pad, b_pad, cout = folded[i]
        y_pad = fused_linear_bn_relu(x_in, w_pad, b_pad)   # [Ni, Cpad]

        x_c.append(y_pad[:, :cout])
        p_c.append(p_j[ii_j])
        b_c.append(b_j[ii_j])

        # --- mapping filter + duplicate-child dedup (host index bookkeeping) ---
        sel = m_np[m_np[:, 2] == depth - i - 2]
        m_proj = sel[:, 0].copy()
        if len(m_proj) != int(y_pad.shape[0]):
            child = sel[:, 1]
            uniq, cnt = np.unique(child, return_counts=True)
            for d in uniq[cnt > 1]:
                dup_pos = np.nonzero(child == d)[0][1:]
                m_proj[dup_pos] = -1
            m_proj = m_proj[m_proj != -1]

        # --- scatter_max pooling to parents (Pallas segment-max kernel) ---
        if i != len(idx) - 1:
            P = int(m_proj.max()) + 1
            counts = np.bincount(m_proj, minlength=P)
            Kmax = max(int(counts.max()), 1)
            idx_pad = np.zeros((P, Kmax), np.int32)
            for pid in range(P):
                rows = np.nonzero(m_proj == pid)[0]
                if rows.size:
                    idx_pad[pid, :rows.size] = rows
                    idx_pad[pid, rows.size:] = rows[0]   # pad = repeat (max-safe)
            mask = (counts > 0).astype(np.float32).reshape(P, 1)
            x_gat = y_pad[jnp.asarray(idx_pad)]          # [P, Kmax, Cpad] gather
            x_proj_pad = segment_max(x_gat, jnp.asarray(mask))

    return p_c, x_c, b_c


# ----------------------------------------------------------------------------
# Example + numpy reference check
# ----------------------------------------------------------------------------
def _np_proj(x, prm, eps=1e-5):
    y = x @ np.asarray(prm["w"]).T + np.asarray(prm["b"])
    s = np.asarray(prm["bn_gamma"]) / np.sqrt(np.asarray(prm["bn_var"]) + eps)
    y = (y - np.asarray(prm["bn_mean"])) * s + np.asarray(prm["bn_beta"])
    return np.maximum(y, 0.0)


if __name__ == "__main__":
    IN_CHANNEL, DIM, DEPTH, EXPAND = 4, 8, 2, 2
    N0, P1 = 16, 4

    key = jax.random.PRNGKey(0)
    kparams, kx, kp = jax.random.split(key, 3)
    raw, folded = prepare_init_params(kparams, IN_CHANNEL, DIM, DEPTH, EXPAND)

    x = jax.random.normal(kx, (N0, IN_CHANNEL), jnp.float32)
    p = jax.random.uniform(kp, (N0, 3), jnp.float32)
    b = jnp.asarray(np.repeat(np.arange(2), N0 // 2), jnp.int32)

    idx = [np.arange(N0, dtype=np.int32), np.arange(P1, dtype=np.int32)]

    # mapping rows: [parent_idx, child_idx, level_tag, unused]; level-0 children
    # carry tag == DEPTH - 0 - 2 == 0
    parent_of = np.repeat(np.arange(P1), N0 // P1)
    m = np.stack([parent_of, np.arange(N0),
                  np.zeros(N0, np.int64), np.ones(N0, np.int64)],
                 axis=1).astype(np.int32)

    p_c, x_c, b_c = init_forward(folded, DEPTH, (p, x, b, idx, m))
    for t in x_c + p_c + b_c:
        jax.block_until_ready(t)

    assert x_c[0].shape == (N0, DIM)
    assert x_c[1].shape == (P1, DIM * EXPAND)
    assert p_c[0].shape == (N0, 3) and b_c[0].shape == (N0,)

    # --- numpy reference (same math, eval-mode BN) ---
    x_np = np.asarray(x)
    y0 = _np_proj(x_np[idx[0]], raw[0])
    pooled = np.full((P1, DIM), -np.inf, np.float32)
    for r, pid in enumerate(parent_of):
        pooled[pid] = np.maximum(pooled[pid], y0[r])
    y1 = _np_proj(pooled[idx[1]], raw[1])
    np.testing.assert_allclose(np.asarray(x_c[0]), y0, rtol=1e-2, atol=1e-2)
    np.testing.assert_allclose(np.asarray(x_c[1]), y1, rtol=1e-2, atol=1e-2)

    print("KERNEL_OK")
</pallas_src>

<mosaic_0001>
module attributes {stable_mosaic.version = 11 : i64} {
  func.func @_proj_kernel(%arg0: i32, %arg1: memref<16x4xf32, #tpu.memory_space<vmem>>, %arg2: memref<4x128xf32, #tpu.memory_space<vmem>>, %arg3: memref<1x128xf32, #tpu.memory_space<vmem>>, %arg4: memref<16x128xf32, #tpu.memory_space<vmem>>) attributes {dimension_semantics = [#tpu.dimension_semantics<parallel>], iteration_bounds = array<i64: 1>, scalar_prefetch = 0 : i64, scratch_operands = 0 : i64, tpu.core_type = #tpu.core_type<tc>, window_params = [{transform_indices = @transform_0, window_bounds = array<i64: 16, 4>}, {pipeline_mode = #tpu.pipeline_mode<synchronous>, transform_indices = @transform_1, window_bounds = array<i64: 4, 128>}, {pipeline_mode = #tpu.pipeline_mode<synchronous>, transform_indices = @transform_2, window_bounds = array<i64: 1, 128>}, {transform_indices = @transform_3, window_bounds = array<i64: 16, 128>}]} {
    %c0 = arith.constant 0 : index
    %c0_0 = arith.constant 0 : index
    %0 = vector.load %arg1[%c0, %c0_0] : memref<16x4xf32, #tpu.memory_space<vmem>>, vector<16x4xf32>
    %c0_1 = arith.constant 0 : index
    %c0_2 = arith.constant 0 : index
    %1 = vector.load %arg2[%c0_1, %c0_2] : memref<4x128xf32, #tpu.memory_space<vmem>>, vector<4x128xf32>
    %cst = arith.constant dense<0.000000e+00> : vector<16x128xf32>
    %2 = tpu.matmul %0, %1, %cst {dimension_numbers = #tpu.dot_dimension_numbers<[1], [0], [0], [1], [0, 0, 1, 1], [], []>} : vector<16x4xf32>, vector<4x128xf32>, vector<16x128xf32> -> vector<16x128xf32>
    %c0_3 = arith.constant 0 : index
    %c0_4 = arith.constant 0 : index
    %3 = vector.load %arg3[%c0_3, %c0_4] : memref<1x128xf32, #tpu.memory_space<vmem>>, vector<1x128xf32>
    %4 = vector.broadcast %3 : vector<1x128xf32> to vector<16x128xf32>
    %5 = arith.addf %2, %4 : vector<16x128xf32>
    %cst_5 = arith.constant 0.000000e+00 : f32
    %6 = vector.broadcast %cst_5 : f32 to vector<16x128xf32>
    %7 = arith.maximumf %5, %6 : vector<16x128xf32>
    %c0_6 = arith.constant 0 : index
    %c0_7 = arith.constant 0 : index
    %8 = vector.load %arg4[%c0_6, %c0_7] : memref<16x128xf32, #tpu.memory_space<vmem>>, vector<16x128xf32>
    tpu.vector_store %arg4[%c0_6, %c0_7], %7 {strides = array<i32>} : memref<16x128xf32, #tpu.memory_space<vmem>>, vector<16x128xf32>,
    return
  }
  func.func @transform_0(%arg0: i32) -> (i32, i32) {
    %c0_i32 = arith.constant 0 : i32
    %c0_i32_0 = arith.constant 0 : i32
    return %arg0, %c0_i32 : i32, i32
  }
  func.func @transform_1(%arg0: i32) -> (i32, i32) {
    %c0_i32 = arith.constant 0 : i32
    %c0_i32_0 = arith.constant 0 : i32
    %c0_i32_1 = arith.constant 0 : i32
    return %c0_i32, %c0_i32_0 : i32, i32
  }
  func.func @transform_2(%arg0: i32) -> (i32, i32) {
    %c0_i32 = arith.constant 0 : i32
    %c0_i32_0 = arith.constant 0 : i32
    %c0_i32_1 = arith.constant 0 : i32
    return %c0_i32, %c0_i32_0 : i32, i32
  }
  func.func @transform_3(%arg0: i32) -> (i32, i32) {
    %c0_i32 = arith.constant 0 : i32
    %c0_i32_0 = arith.constant 0 : i32
    return %arg0, %c0_i32 : i32, i32
  }
}

</mosaic_0001>

<bundles_post_ra>
// kernel: tpu_custom_call.1
= control target key start
LH: loop header
LB: loop body
LE: loop exit
PB: predicated region body
PF: predicated region fallthrough
CT: control target
= control target key end

     0   :  { %vm32_vm0 = vcmask 1043456   ;;  %vm25_vm1 = vcmask 31744   ;;  %s217_s0 = inlined_call_operand.vmem [shape: f32[16,4], index: 0, kind: input, shape index: {}]   ;;  %s218_s1 = inlined_call_operand.vmem [shape: f32[4,128], index: 1, kind: input, shape index: {}]   ;;  %s219_s2 = inlined_call_operand.vmem [shape: f32[1,128], index: 2, kind: input, shape index: {}]   ;;  %s220_s3 = inlined_call_operand.hbm [shape: f32[16,128], index: 3, kind: output, shape index: {}]  }
   0x1   :  { %v17_v0 = vld [vmem:[%s218_s1] sm:$0xf]  ;;  %v16_v2 = vld [vmem:[%s217_s0 + $0x8] sm:$0xff] }
   0x2   :  { %v15_v1 = vld [vmem:[%s217_s0] sm:$0xff]  ;;  %138 = vmatprep.subr.msk.mxu0 %vm32_vm0, %v17_v0 }
   0x3   :  { %140 = vmatprep.mubr.msk.f32.mxu0 %vm25_vm1, %v15_v1 }
   0x4   :  { %8 = vsyncpa [#allocation3], 0  ;;  %139 = vmatpush3.msk.msra.mxu0 %vm32_vm0, %v17_v0  ;;  %v131_v3 = vld [vmem:[%s219_s2] ss:$0 sm:$0xff]  ;;  %s170_s1 = smov [#allocation2]  }
   0x5   :  { %141 = vmatmul.mubr.msk.f32.vlgmr.msra.gmra.mrb[0].mxu0 %vm25_vm1, %v16_v2  ;;  %s120_s20 = sshll.u32 %s170_s1, 4  ;;  %s121_s20 = int_to_ptr.vmem [resolvable:$true] %s120_s20 }
   0x6   :  { %s146_s0 = scalar_lea.vmem %s121_s20, 256  ;;  %p151_p1 = scmp.lt.s32.totalorder %s121_s20, %s121_s20 }
   0x7   :  { %p147_p0 = scmp.ne.s32.totalorder %s121_s20, %s146_s0  ;;  %p152_p2 = scmp.lt.s32.totalorder %s146_s0, %s146_s0 }
   0x9   :  { %p153_p3 = por %p152_p2, %p151_p1 }
   0xb   :  { %p154_p4 = pnand %p153_p3, %p147_p0 }
  0xd8   :  { %v142_v4 = vpop.f32.mrb[0].mxu0 }
  0xd9   :  { %v108_v5 = vadd.f32 %v142_v4, %v131_v3  ;;  %v102_v6 = vpop.f32.mrb[1].mxu0 }
  0xda   :  { %v103_v7 = vadd.f32 %v131_v3, %v102_v6 }
  0xdb   :  { %v112_v8 = vmax.f32 %v108_v5, 0.0 }
  0xdc   :  { %v111_v9 = vmax.f32 %v103_v7, 0.0 }
  0xdd   :  { %114 = vst [vmem:[#allocation2 + $0x8] sm:$0xff] %v112_v8 }
  0xde   :  { %113 = vst [vmem:[#allocation2] sm:$0xff] %v111_v9 }
  0xdf   :  { %157 = shalt.err (!%p154_p4)
}
  0xe0   :  { %s158_s22 = scalar_lea.hbm %s220_s3, 256 }
  0xe1   :  { %p159_p5 = scmp.ne.s32.totalorder %s220_s3, %s158_s22  ;;  %p162_p6 = scmp.lt.u32.totalorder %s158_s22, %s220_s3 }
  0xe3   :  { %p164_p7 = pnand %p162_p6, %p159_p5 }
  0xe5   :  { %167 = shalt.err (!%p164_p7)
}
  0xe6   :  { %s171_s27 = smov 128   ;;  %s172_s28 = smov 8  }
  0xe7   :  { %126 = dma.vmem_to_hbm [thread:$0]  %s121_s20, 256, %s220_s3, [#allocation3], %s171_s27, %s171_s27, %s172_s28  }
  0xe8   :  { %168 = dma.done.wait [#allocation3], 256  }
  0xe9   :  { %169 = vsyncadd [#allocation3], 4294967040 }
  0xea   :  { %130 = vsyncpa [#allocation3], 1 }

</bundles_post_ra>
